<compile_context>
chip_gen: v5e
topology: v5e:2x2
jax: 0.10.0
libtpu: 0.0.40
codegen_flags: <defaults>
</compile_context>

<pallas_src>
import functools

import jax
import jax.numpy as jnp
from jax.experimental import pallas as pl
from jax.experimental.pallas import tpu as pltpu


def _round_up(x, m):
    return ((x + m - 1) // m) * m


def _sublane_granule(itemsize):
    # f32 -> 8, bf16 -> 16, int8/fp8 -> 32 (sub-32-bit dtypes pack along sublanes)
    return max(8, 32 // max(1, itemsize))


def _pick_tile(n, c, itemsize, n_streams, max_rows_per_tile=None):
    """Bytes-targeted row tile: ~2 MiB per input block, sublane-aligned, capped so
    (n_streams x 2 pipeline buffers) stays well inside the v7x scoped-VMEM budget."""
    granule = _sublane_granule(itemsize)
    row_bytes = max(1, c * itemsize)
    target_block_bytes = 2 << 20                       # ~2 MiB / block
    tm = max(granule, ((target_block_bytes // row_bytes) // granule) * granule)
    budget = 20 << 20                                  # resident input-buffer budget
    while tm > granule and n_streams * 2 * tm * row_bytes > budget:
        tm = max(granule, ((tm // 2) // granule) * granule)
    tm = min(tm, _round_up(n, granule))
    if max_rows_per_tile is not None:                  # test/override knob
        tm = min(tm, max(granule, _round_up(max_rows_per_tile, granule)))
    num_tiles = pl.cdiv(n, tm)
    block_bytes = tm * row_bytes
    # Explicit scoped-VMEM request: buffers + slack, clamped to the v7x-safe 32 MiB.
    vmem_limit = int(min(32 << 20, max(16 << 20, n_streams * 2 * block_bytes + (6 << 20))))
    return tm, num_tiles, vmem_limit
# TODO(synk): add a column-tiled (online-softmax / partial-sum) fallback for very
# large C where even an 8-row block exceeds the v7x scoped-VMEM budget.


# ----------------------------------------------------------------------------
# 'acc' / 'err': argmax(softmax(x)) == argmax(x), so the kernel only streams the
# inputs and emits per-row argmax indices (lane-dense (1, TM) int32).  The wrapper
# gathers targets[arange(N), idx] — this halves HBM bytes vs. streaming targets.
# ----------------------------------------------------------------------------
def _argmax_kernel(x_ref, o_ref):
    x = x_ref[...].astype(jnp.float32)
    tm, n_cls = x.shape
    iota = jax.lax.broadcasted_iota(jnp.int32, x.shape, 1)
    rowmax = jnp.max(x, axis=-1, keepdims=True)
    # np.argmax tie-break: first maximal index.  NOTE: all-NaN rows yield index 0.
    cand = jnp.where(x == rowmax, iota, n_cls)
    amax = jnp.min(cand, axis=-1, keepdims=True)       # (TM, 1)
    # (TM, 1) column -> lane-dense (1, TM) row: full vst instead of vst.msk.
    o_ref[...] = amax.reshape(1, tm)


# ----------------------------------------------------------------------------
# 'softacc' / 'softerr': ret[i] = sum_j softmax(x)[i, j] * t[i, j]  (or 1 - that).
# ----------------------------------------------------------------------------
def _soft_metric_kernel(x_ref, t_ref, o_ref, *, mode):
    x = x_ref[...].astype(jnp.float32)
    t = t_ref[...].astype(jnp.float32)
    tm = x.shape[0]
    m = jnp.max(x, axis=-1, keepdims=True)
    e = jnp.exp(x - m)
    denom = jnp.sum(e, axis=-1, keepdims=True)
    # Exact per-row divide on a (TM, 1) column — negligible next to the HBM stream.
    s = jnp.sum(e * t, axis=-1, keepdims=True) / denom
    val = s if mode == "softacc" else 1.0 - s
    o_ref[...] = val.reshape(1, tm)


# ----------------------------------------------------------------------------
# R2: sum((x - t)^2) / sum((x - mean(t))^2).
# Grid is (2 cores, tiles_per_core): the leading "parallel" axis lets v7x's two
# TensorCores each stream half the rows; each core keeps (1, C) lane-vector
# accumulators (axis-0 partial reductions only) and emits four scalar partials in
# its epilogue.  The wrapper combines the per-core partials.  Padded rows (last
# tile) and the duplicated clamped tile (odd tile count) are masked to zero.
# ----------------------------------------------------------------------------
def _r2_kernel(x_ref, t_ref, num_ref, sx_ref, sxx_ref, st_ref,
               num_acc, x_acc, xx_acc, t_acc, *, n_rows, tm, tiles_per_core):
    step = pl.program_id(1)

    @pl.when(step == 0)
    def _():
        num_acc[...] = jnp.zeros_like(num_acc)
        x_acc[...] = jnp.zeros_like(x_acc)
        xx_acc[...] = jnp.zeros_like(xx_acc)
        t_acc[...] = jnp.zeros_like(t_acc)

    x = x_ref[...].astype(jnp.float32)
    t = t_ref[...].astype(jnp.float32)

    # Global (un-clamped) tile -> row ids; rows >= n_rows contribute nothing.
    tile = pl.program_id(0) * tiles_per_core + step
    row = tile * tm + jax.lax.broadcasted_iota(jnp.int32, x.shape, 0)
    valid = row < n_rows
    x = jnp.where(valid, x, 0.0)
    t = jnp.where(valid, t, 0.0)

    d = x - t
    # Sublane (axis-0) partial reductions only; lane reduction deferred to epilogue.
    num_acc[...] += jnp.sum(d * d, axis=0, keepdims=True)
    x_acc[...] += jnp.sum(x, axis=0, keepdims=True)
    xx_acc[...] += jnp.sum(x * x, axis=0, keepdims=True)
    t_acc[...] += jnp.sum(t, axis=0, keepdims=True)

    @pl.when(step == pl.num_programs(1) - 1)
    def _():
        num_ref[...] = jnp.sum(num_acc[...], keepdims=True)
        sx_ref[...] = jnp.sum(x_acc[...], keepdims=True)
        sxx_ref[...] = jnp.sum(xx_acc[...], keepdims=True)
        st_ref[...] = jnp.sum(t_acc[...], keepdims=True)


# ----------------------------------------------------------------------------
# Wrapper mirroring `metrics(type_loss=...)` forward
# ----------------------------------------------------------------------------
def metrics_forward(inputs, targets, type_loss="acc", *, max_rows_per_tile=None):
    # No wrapper-side f32 cast: stream the source dtype, upcast inside the kernel.
    inputs = jnp.asarray(inputs)
    targets = jnp.asarray(targets)
    n, c = inputs.shape
    itemsize = inputs.dtype.itemsize

    if type_loss == "R2":
        n_cores = 2
        tm, num_tiles, vmem_limit = _pick_tile(
            n, c, itemsize, n_streams=2, max_rows_per_tile=max_rows_per_tile)
        tiles_per_core = pl.cdiv(num_tiles, n_cores)

        def in_map(core, i):
            # Clamp so the padded last grid step (odd tile count) stays in-bounds;
            # the kernel's row mask zeroes that duplicated tile's contribution.
            return (jnp.minimum(core * tiles_per_core + i, num_tiles - 1), 0)

        kern = functools.partial(
            _r2_kernel, n_rows=n, tm=tm, tiles_per_core=tiles_per_core)
        part_shape = jax.ShapeDtypeStruct((n_cores, 1), jnp.float32)
        part_spec = pl.BlockSpec((1, 1), lambda core, i: (core, 0))
        num_p, sx_p, sxx_p, st_p = pl.pallas_call(
            kern,
            out_shape=(part_shape,) * 4,
            grid=(n_cores, tiles_per_core),
            in_specs=[pl.BlockSpec((tm, c), in_map),
                      pl.BlockSpec((tm, c), in_map)],
            out_specs=(part_spec,) * 4,
            scratch_shapes=[pltpu.VMEM((1, c), jnp.float32)] * 4,
            compiler_params=pltpu.CompilerParams(
                dimension_semantics=("parallel", "arbitrary"),
                vmem_limit_bytes=vmem_limit),
            cost_estimate=pl.CostEstimate(
                flops=8 * n * c,
                transcendentals=0,
                bytes_accessed=2 * n * c * itemsize + 4 * n_cores * 4),
        )(inputs, targets)
        num = jnp.sum(num_p)
        sx = jnp.sum(sx_p)
        sxx = jnp.sum(sxx_p)
        st = jnp.sum(st_p)
        total = jnp.float32(n * c)
        mean_t = st / total
        den = sxx - 2.0 * mean_t * sx + total * mean_t * mean_t
        return num / den

    if type_loss in ("acc", "err"):
        tm, num_tiles, vmem_limit = _pick_tile(
            n, c, itemsize, n_streams=1, max_rows_per_tile=max_rows_per_tile)
        idx = pl.pallas_call(
            _argmax_kernel,
            out_shape=jax.ShapeDtypeStruct((num_tiles, tm), jnp.int32),
            grid=(num_tiles,),
            in_specs=[pl.BlockSpec((tm, c), lambda i: (i, 0))],
            out_specs=pl.BlockSpec((1, tm), lambda i: (i, 0)),
            compiler_params=pltpu.CompilerParams(
                dimension_semantics=("parallel",),   # rows independent -> megacore
                vmem_limit_bytes=vmem_limit),
            cost_estimate=pl.CostEstimate(
                flops=3 * n * c,
                transcendentals=0,
                bytes_accessed=n * c * itemsize + num_tiles * tm * 4),
        )(inputs)
        # lane-dense (num_tiles, TM) -> per-row indices (rows past N are padding)
        idx = idx.reshape(num_tiles * tm)[:n]
        gathered = jnp.take_along_axis(targets, idx[:, None], axis=-1)[:, 0]
        gathered = gathered.astype(jnp.float32)
        return gathered if type_loss == "acc" else 1.0 - gathered

    if type_loss in ("softacc", "softerr"):
        tm, num_tiles, vmem_limit = _pick_tile(
            n, c, itemsize, n_streams=2, max_rows_per_tile=max_rows_per_tile)
        kern = functools.partial(_soft_metric_kernel, mode=type_loss)
        out = pl.pallas_call(
            kern,
            out_shape=jax.ShapeDtypeStruct((num_tiles, tm), jnp.float32),
            grid=(num_tiles,),
            in_specs=[
                pl.BlockSpec((tm, c), lambda i: (i, 0)),
                pl.BlockSpec((tm, c), lambda i: (i, 0)),
            ],
            out_specs=pl.BlockSpec((1, tm), lambda i: (i, 0)),
            compiler_params=pltpu.CompilerParams(
                dimension_semantics=("parallel",),
                vmem_limit_bytes=vmem_limit),
            cost_estimate=pl.CostEstimate(
                flops=6 * n * c,
                transcendentals=n * c,
                bytes_accessed=2 * n * c * itemsize + num_tiles * tm * 4),
        )(inputs, targets)
        return out.reshape(num_tiles * tm)[:n]

    # TODO(synk): 'auc' uses sklearn.roc_auc_score (sorting / rank statistics); no
    # clean Pallas equivalent implemented here.
    raise NotImplementedError(f"type_loss={type_loss!r} not implemented")


if __name__ == "__main__":
    key = jax.random.PRNGKey(0)
    k1, k2, k3, k4 = jax.random.split(key, 4)

    # ---------------- case 1: small single-tile shapes ----------------
    N, C = 8, 16  # batch of 8 samples, 16 classes
    inputs = jax.random.normal(k1, (N, C), dtype=jnp.float32)
    targets = jax.random.uniform(k2, (N, C), dtype=jnp.float32)  # soft targets

    p = jax.nn.softmax(inputs, axis=-1)
    ref_acc = targets[jnp.arange(N), jnp.argmax(inputs, axis=-1)]
    ref_softacc = jnp.sum(p * targets, axis=-1)
    ref_r2 = jnp.sum((inputs - targets) ** 2) / jnp.sum(
        (inputs - jnp.mean(targets)) ** 2)

    acc = metrics_forward(inputs, targets, "acc")
    jax.block_until_ready(acc)
    assert acc.shape == (N,)
    assert jnp.allclose(acc, ref_acc, atol=1e-6), (acc, ref_acc)

    err = metrics_forward(inputs, targets, "err")
    jax.block_until_ready(err)
    assert jnp.allclose(err, 1.0 - ref_acc, atol=1e-6)

    softacc = metrics_forward(inputs, targets, "softacc")
    jax.block_until_ready(softacc)
    assert jnp.allclose(softacc, ref_softacc, atol=1e-5)

    softerr = metrics_forward(inputs, targets, "softerr")
    jax.block_until_ready(softerr)
    assert jnp.allclose(softerr, 1.0 - ref_softacc, atol=1e-5)

    r2 = metrics_forward(inputs, targets, "R2")
    jax.block_until_ready(r2)
    assert jnp.allclose(r2, ref_r2, rtol=1e-4, atol=1e-5)

    # ------- case 2: multi-tile path (partial last tile, odd tile count ->
    #          clamped R2 grid step, per-core partial sums) via the tile override -
    N2, C2, cap = 40, 24, 16
    inputs2 = jax.random.normal(k3, (N2, C2), dtype=jnp.float32)
    targets2 = jax.random.uniform(k4, (N2, C2), dtype=jnp.float32)
    p2 = jax.nn.softmax(inputs2, axis=-1)
    ref_acc2 = targets2[jnp.arange(N2), jnp.argmax(inputs2, axis=-1)]
    ref_soft2 = jnp.sum(p2 * targets2, axis=-1)
    ref_r22 = jnp.sum((inputs2 - targets2) ** 2) / jnp.sum(
        (inputs2 - jnp.mean(targets2)) ** 2)

    acc2 = metrics_forward(inputs2, targets2, "acc", max_rows_per_tile=cap)
    jax.block_until_ready(acc2)
    assert jnp.allclose(acc2, ref_acc2, atol=1e-6)

    soft2 = metrics_forward(inputs2, targets2, "softacc", max_rows_per_tile=cap)
    jax.block_until_ready(soft2)
    assert jnp.allclose(soft2, ref_soft2, atol=1e-5)

    r22 = metrics_forward(inputs2, targets2, "R2", max_rows_per_tile=cap)
    jax.block_until_ready(r22)
    assert jnp.allclose(r22, ref_r22, rtol=1e-4, atol=1e-5)

    print("KERNEL_OK")
</pallas_src>

<mosaic_0001>
module attributes {stable_mosaic.version = 11 : i64} {
  func.func @_argmax_kernel(%arg0: i32, %arg1: memref<8x16xf32, #tpu.memory_space<vmem>>, %arg2: memref<1x8xi32, #tpu.memory_space<vmem>>) attributes {dimension_semantics = [#tpu.dimension_semantics<parallel>], iteration_bounds = array<i64: 1>, scalar_prefetch = 0 : i64, scratch_operands = 0 : i64, tpu.core_type = #tpu.core_type<tc>, window_params = [{transform_indices = @transform_0, window_bounds = array<i64: 8, 16>}, {transform_indices = @transform_1, window_bounds = array<i64: 1, 8>}]} {
    %c0 = arith.constant 0 : index
    %c0_0 = arith.constant 0 : index
    %0 = vector.load %arg1[%c0, %c0_0] : memref<8x16xf32, #tpu.memory_space<vmem>>, vector<8x16xf32>
    %1 = tpu.iota {dimensions = array<i32: 1>} : vector<8x16xi32>
    %cst = arith.constant dense<0xFF800000> : vector<8xf32>
    %2 = vector.multi_reduction <maximumf>, %0, %cst [1] : vector<8x16xf32> to vector<8xf32>
    %3 = vector.shape_cast %2 : vector<8xf32> to vector<8x1xf32>
    %4 = vector.broadcast %3 : vector<8x1xf32> to vector<8x16xf32>
    %5 = arith.cmpf oeq, %0, %4 : vector<8x16xf32>
    %c16_i32 = arith.constant 16 : i32
    %6 = vector.broadcast %c16_i32 : i32 to vector<8x16xi32>
    %7 = arith.select %5, %1, %6 : vector<8x16xi1>, vector<8x16xi32>
    %cst_1 = arith.constant dense<2147483647> : vector<8xi32>
    %8 = vector.multi_reduction <minsi>, %7, %cst_1 [1] : vector<8x16xi32> to vector<8xi32>
    %9 = vector.shape_cast %8 : vector<8xi32> to vector<8x1xi32>
    %10 = vector.shape_cast %9 : vector<8x1xi32> to vector<1x8xi32>
    %c0_2 = arith.constant 0 : index
    %c0_3 = arith.constant 0 : index
    %11 = vector.load %arg2[%c0_2, %c0_3] : memref<1x8xi32, #tpu.memory_space<vmem>>, vector<1x8xi32>
    tpu.vector_store %arg2[%c0_2, %c0_3], %10 {strides = array<i32>} : memref<1x8xi32, #tpu.memory_space<vmem>>, vector<1x8xi32>,
    return
  }
  func.func @transform_0(%arg0: i32) -> (i32, i32) {
    %c0_i32 = arith.constant 0 : i32
    %c0_i32_0 = arith.constant 0 : i32
    return %arg0, %c0_i32 : i32, i32
  }
  func.func @transform_1(%arg0: i32) -> (i32, i32) {
    %c0_i32 = arith.constant 0 : i32
    %c0_i32_0 = arith.constant 0 : i32
    return %arg0, %c0_i32 : i32, i32
  }
}

</mosaic_0001>

<bundles_post_ra>
// kernel: tpu_custom_call.1
= control target key start
LH: loop header
LB: loop body
LE: loop exit
PB: predicated region body
PF: predicated region fallthrough
CT: control target
= control target key end

     0   :  { %6 = vsyncpa [#allocation3], 0  ;;  %s139_s0 = inlined_call_operand.hbm [shape: f32[8,16], index: 0, kind: input, shape index: {}]   ;;  %s140_s1 = inlined_call_operand.hbm [shape: s32[1,8], index: 1, kind: output, shape index: {}]  }
   0x1   :  { %7 = vsyncpa [#allocation4], 0  ;;  %s13_s8 = sshll.u32 %s139_s0, 4  ;;  %s121_s9 = smov [#allocation2]   ;;  %s14_s8 = int_to_ptr.hbm [resolvable:$true] %s13_s8 }
   0x2   :  { %s15_s10 = sshll.u32 %s121_s9, 4  ;;  %s16_s10 = int_to_ptr.vmem [resolvable:$true] %s15_s10 }
   0x3   :  { %18 = dma.hbm_to_vmem [thread:$0]  %s14_s8, 128, %s16_s10, [#allocation3]  }
   0x4   :  { %117 = dma.done.wait [#allocation3], 128  }
   0x5   :  { %118 = vsyncadd [#allocation3], 4294967168  ;;  %vm26_vm0 = vcmask 130048   ;;  %v23_v0 = vld [vmem:[#allocation2] sm:$0xff]  ;;  %v24_v2 = vlaneseq  ;;  %s122_s0 = smov [#allocation5]   ;;  %s57_s14 = sshll.u32 %s140_s1, 4  ;;  %s58_s14 = int_to_ptr.hbm [resolvable:$true] %s57_s14 }
   0x6   :  { %v27_v1 = vsel %vm26_vm0, %v23_v0, -inf  ;;  %s55_s11 = sshll.u32 %s122_s0, 4  ;;  %vm48_vm3 = vcmask 57344   ;;  %s56_s11 = int_to_ptr.vmem [resolvable:$true] %s55_s11 }
   0x7   :  { %28 = vmax.xlane.f32.xlu0 %v27_v1  ;;  %v25_v3 = vand.u32 127, %v24_v2 }
  0x7a   :  { %v29_v4 = vpop.xlane.xlu0 %28 }
  0x7b   :  { %vm30_vm1 = vcmp.eq.f32.partialorder %v23_v0, %v29_v4 }
  0x7c   :  { %v31_v5 = vsel %vm30_vm1, %v25_v3, 16 }
  0x7d   :  { %v32_v6 = vsel %vm26_vm0, %v31_v5, 2147483647 }
  0x7e   :  { %v34_v7 = vshra.s32 %v32_v6, 16  ;;  %v33_v9 = vand.u32 65535, %v32_v6 }
  0x80   :  { %v36_v8 = vcvt.s32.f32 %v34_v7  ;;  %v35_v11 = vcvt.s32.f32 %v33_v9 }
  0x82   :  { %37 = vmin.xlane.f32.xlu0 %v36_v8 }
  0xf5   :  { %v38_v10 = vpop.xlane.xlu0 %37 }
  0xf6   :  { %vm39_vm2 = vcmp.eq.f32.partialorder %v36_v8, %v38_v10  ;;  %v44_v13 = vcvt.f32.s32 %v38_v10 }
  0xf7   :  { %v40_v12 = vsel %vm39_vm2, %v35_v11, inf }
  0xf8   :  { %41 = vmin.xlane.f32.xlu1 %v40_v12  ;;  %v45_v15 = vshll.u32 %v44_v13, 16 }
 0x16b   :  { %v42_v14 = vpop.xlane.xlu1 %41 }
 0x16c   :  { %v43_v16 = vcvt.f32.s32 %v42_v14 }
 0x16e   :  { %v46_v17 = vadd.s32 %v45_v15, %v43_v16 }
 0x170   :  { %v47_v18 = vperm.slane %v46_v17, %v25_v3 }
 0x172   :  { %49 = vst.msk [vmem:[#allocation5] sm:$0x1] %vm48_vm3, %v47_v18 }
 0x173   :  { %60 = dma.vmem_to_hbm [thread:$0]  %s56_s11, 16, %s58_s14, [#allocation4]  }
 0x174   :  { %119 = dma.done.wait [#allocation4], 16  }
 0x175   :  { %120 = vsyncadd [#allocation4], 4294967280 }
 0x176   :  { %65 = vsyncpa [#allocation3], 1 }
 0x177   :  { %66 = vsyncpa [#allocation4], 1 }

</bundles_post_ra>
